<compile_context>
chip_gen: v5e
topology: v5e:2x2
jax: 0.10.0
libtpu: 0.0.40
codegen_flags: <defaults>
</compile_context>

<pallas_src>
import functools

import jax
import jax.numpy as jnp
from jax.experimental import pallas as pl
from jax.experimental.pallas import tpu as pltpu


def _cosface_kernel(cos_ref, label_ref, out_ref, *, s: float, m: float):
    """One (bt, tc) tile: out = s * (cos - m * onehot(label))."""
    j = pl.program_id(1)                         # class-tile index
    tc = cos_ref.shape[1]                        # static tile width
    cos = cos_ref[...].astype(jnp.float32)       # (bt, tc)
    lbl = label_ref[...]                         # (bt, 1) int32
    # Global column index of every element in this tile.
    col = j * tc + jax.lax.broadcasted_iota(jnp.int32, cos.shape, 1)
    hit = jnp.logical_and(col == lbl, lbl != -1)  # (bt, tc) bool
    margin = jnp.where(hit, jnp.float32(m), jnp.float32(0.0))
    out_ref[...] = ((cos - margin) * jnp.float32(s)).astype(out_ref.dtype)


def cosface(cosine, label, *, s: float = 64.0, m: float = 0.4,
            block_rows: int = 256, block_cols: int = 2048, out_dtype=None):
    """Pallas implementation of CosFace.forward(cosine, label).

    cosine: (B, C) float logits (cosine similarities).
    label:  (B,)   int class ids; -1 means "apply no margin to this row".
    block_rows must be a multiple of 8 (sublane), block_cols a multiple of
    128 (lane) whenever they actually tile (i.e. B > block_rows / C >
    block_cols).  Defaults give ~2 MiB f32 per buffer.
    """
    B, C = cosine.shape
    out_dtype = cosine.dtype if out_dtype is None else out_dtype
    label2d = label.astype(jnp.int32).reshape(B, 1)

    # Full-extent blocks are always legal; tiled blocks must obey (8, 128).
    if B <= block_rows:
        bt = B
    else:
        assert block_rows % 8 == 0, "block_rows must be a multiple of 8"
        bt = block_rows
    if C <= block_cols:
        tc = C
    else:
        assert block_cols % 128 == 0, "block_cols must be a multiple of 128"
        tc = block_cols

    grid = (pl.cdiv(B, bt), pl.cdiv(C, tc))
    kernel = functools.partial(_cosface_kernel, s=float(s), m=float(m))

    return pl.pallas_call(
        kernel,
        out_shape=jax.ShapeDtypeStruct((B, C), out_dtype),
        grid=grid,
        in_specs=[
            pl.BlockSpec((bt, tc), lambda i, j: (i, j)),
            pl.BlockSpec((bt, 1), lambda i, j: (i, 0)),
        ],
        out_specs=pl.BlockSpec((bt, tc), lambda i, j: (i, j)),
        compiler_params=pltpu.CompilerParams(
            dimension_semantics=("parallel", "parallel")),
    )(cosine, label2d)


def _reference(cosine, label, s, m):
    col = jnp.arange(cosine.shape[1], dtype=jnp.int32)[None, :]
    lbl = label.astype(jnp.int32)[:, None]
    hit = (col == lbl) & (lbl != -1)
    margin = jnp.where(hit, jnp.float32(m), jnp.float32(0.0))
    return (cosine.astype(jnp.float32) - margin) * jnp.float32(s)


if __name__ == "__main__":
    S, M = 64.0, 0.4
    key = jax.random.PRNGKey(0)
    k1, k2, k3, k4, k5, k6 = jax.random.split(key, 6)

    # ---- small single-tile case -------------------------------------------
    B, C = 8, 512
    cosine = jax.random.uniform(k1, (B, C), dtype=jnp.float32,
                                minval=-1.0, maxval=1.0)
    label = jax.random.randint(k2, (B,), 0, C, dtype=jnp.int32)
    label = label.at[1].set(-1)   # rows the torch code skips (label == -1)
    label = label.at[5].set(-1)

    out = jax.block_until_ready(cosface(cosine, label, s=S, m=M))
    ref = _reference(cosine, label, S, M)
    assert out.shape == (B, C)
    assert bool(jnp.all(jnp.isfinite(out)))
    assert bool(jnp.allclose(out, ref, rtol=1e-6, atol=1e-6))

    # ---- multi-tile case: ragged batch tile + several class tiles ----------
    B2, C2 = 20, 512
    cosine2 = jax.random.uniform(k3, (B2, C2), dtype=jnp.float32,
                                 minval=-1.0, maxval=1.0)
    label2 = jax.random.randint(k4, (B2,), 0, C2, dtype=jnp.int32)
    label2 = label2.at[3].set(-1)

    out2 = jax.block_until_ready(
        cosface(cosine2, label2, s=S, m=M, block_rows=8, block_cols=128))
    ref2 = _reference(cosine2, label2, S, M)
    assert out2.shape == (B2, C2)
    assert bool(jnp.allclose(out2, ref2, rtol=1e-6, atol=1e-6))

    # ---- ragged in both batch and class dimensions -------------------------
    B3, C3 = 12, 200
    cosine3 = jax.random.uniform(k5, (B3, C3), dtype=jnp.float32,
                                 minval=-1.0, maxval=1.0)
    label3 = jax.random.randint(k6, (B3,), 0, C3, dtype=jnp.int32)
    label3 = label3.at[0].set(-1)

    out3 = jax.block_until_ready(
        cosface(cosine3, label3, s=S, m=M, block_rows=8, block_cols=128))
    ref3 = _reference(cosine3, label3, S, M)
    assert out3.shape == (B3, C3)
    assert bool(jnp.allclose(out3, ref3, rtol=1e-6, atol=1e-6))

    print("KERNEL_OK")
</pallas_src>

<mosaic_0001>
module attributes {stable_mosaic.version = 11 : i64} {
  func.func @_cosface_kernel(%arg0: i32, %arg1: i32, %arg2: memref<8x512xf32, #tpu.memory_space<vmem>>, %arg3: memref<8x1xi32, #tpu.memory_space<vmem>>, %arg4: memref<8x512xf32, #tpu.memory_space<vmem>>) attributes {dimension_semantics = [#tpu.dimension_semantics<parallel>, #tpu.dimension_semantics<parallel>], iteration_bounds = array<i64: 1, 1>, scalar_prefetch = 0 : i64, scratch_operands = 0 : i64, tpu.core_type = #tpu.core_type<tc>, window_params = [{transform_indices = @transform_0, window_bounds = array<i64: 8, 512>}, {transform_indices = @transform_1, window_bounds = array<i64: 8, 1>}, {transform_indices = @transform_2, window_bounds = array<i64: 8, 512>}]} {
    %c0 = arith.constant 0 : index
    %c0_0 = arith.constant 0 : index
    %0 = vector.load %arg2[%c0, %c0_0] : memref<8x512xf32, #tpu.memory_space<vmem>>, vector<8x512xf32>
    %c0_1 = arith.constant 0 : index
    %c0_2 = arith.constant 0 : index
    %1 = vector.load %arg3[%c0_1, %c0_2] : memref<8x1xi32, #tpu.memory_space<vmem>>, vector<8x1xi32>
    %c512_i32 = arith.constant 512 : i32
    %2 = arith.muli %arg1, %c512_i32 : i32
    %3 = tpu.iota {dimensions = array<i32: 1>} : vector<8x512xi32>
    %4 = vector.broadcast %2 : i32 to vector<8x512xi32>
    %5 = arith.addi %4, %3 : vector<8x512xi32>
    %6 = vector.broadcast %1 : vector<8x1xi32> to vector<8x512xi32>
    %7 = arith.cmpi eq, %5, %6 : vector<8x512xi32>
    %c-1_i32 = arith.constant -1 : i32
    %8 = vector.broadcast %c-1_i32 : i32 to vector<8x1xi32>
    %9 = arith.cmpi ne, %1, %8 : vector<8x1xi32>
    %10 = vector.broadcast %9 : vector<8x1xi1> to vector<8x512xi1>
    %11 = arith.andi %7, %10 : vector<8x512xi1>
    %cst = arith.constant 4.000000e-01 : f32
    %cst_3 = arith.constant 0.000000e+00 : f32
    %12 = vector.broadcast %cst : f32 to vector<8x512xf32>
    %13 = vector.broadcast %cst_3 : f32 to vector<8x512xf32>
    %14 = arith.select %11, %12, %13 : vector<8x512xi1>, vector<8x512xf32>
    %15 = arith.subf %0, %14 : vector<8x512xf32>
    %cst_4 = arith.constant 6.400000e+01 : f32
    %16 = vector.broadcast %cst_4 : f32 to vector<8x512xf32>
    %17 = arith.mulf %15, %16 : vector<8x512xf32>
    %c0_5 = arith.constant 0 : index
    %c0_6 = arith.constant 0 : index
    %18 = vector.load %arg4[%c0_5, %c0_6] : memref<8x512xf32, #tpu.memory_space<vmem>>, vector<8x512xf32>
    tpu.vector_store %arg4[%c0_5, %c0_6], %17 {strides = array<i32>} : memref<8x512xf32, #tpu.memory_space<vmem>>, vector<8x512xf32>,
    return
  }
  func.func @transform_0(%arg0: i32, %arg1: i32) -> (i32, i32) {
    %c0_i32 = arith.constant 0 : i32
    return %arg0, %arg1 : i32, i32
  }
  func.func @transform_1(%arg0: i32, %arg1: i32) -> (i32, i32) {
    %c0_i32 = arith.constant 0 : i32
    %c0_i32_0 = arith.constant 0 : i32
    return %arg0, %c0_i32 : i32, i32
  }
  func.func @transform_2(%arg0: i32, %arg1: i32) -> (i32, i32) {
    %c0_i32 = arith.constant 0 : i32
    return %arg0, %arg1 : i32, i32
  }
}

</mosaic_0001>

<bundles_post_ra>
// kernel: tpu_custom_call.1
= control target key start
LH: loop header
LB: loop body
LE: loop exit
PB: predicated region body
PF: predicated region fallthrough
CT: control target
= control target key end

     0   :  { %7 = vsyncpa [#allocation3], 0  ;;  %s177_s0 = inlined_call_operand.hbm [shape: f32[8,512], index: 0, kind: input, shape index: {}]   ;;  %s178_s1 = inlined_call_operand.vmem [shape: s32[8,1], index: 1, kind: input, shape index: {}]   ;;  %s179_s2 = inlined_call_operand.hbm [shape: f32[8,512], index: 2, kind: output, shape index: {}]  }
   0x1   :  { %8 = vsyncpa [#allocation4], 0  ;;  %s14_s11 = sshll.u32 %s177_s0, 4  ;;  %s149_s12 = smov [#allocation2]   ;;  %s15_s11 = int_to_ptr.hbm [resolvable:$true] %s14_s11 }
   0x2   :  { %s16_s13 = sshll.u32 %s149_s12, 4  ;;  %s17_s13 = int_to_ptr.vmem [resolvable:$true] %s16_s13 }
   0x3   :  { %19 = dma.hbm_to_vmem [thread:$0]  %s15_s11, 512, %s17_s13, [#allocation3]  }
   0x4   :  { %145 = dma.done.wait [#allocation3], 512  }
   0x5   :  { %146 = vsyncadd [#allocation3], 4294966784  ;;  %v150_v0 = vmov 0   ;;  %v30_v1 = vld [vmem:[%s178_s1] sm:$0xff]  ;;  %v32_v3 = vlaneseq  ;;  %v27_v11 = vld [vmem:[#allocation2 + $0x8] sm:$0xff]  ;;  %v151_v13 = vmov 0.0  }
   0x6   :  { %96 = vset.pattern.permute.xlu0 %v150_v0  ;;  %vm49_vm0 = vcmp.ne.s32.totalorder %v30_v1, 4294967295  ;;  %v26_v10 = vld [vmem:[#allocation2] sm:$0xff]  ;;  %v28_v12 = vld [vmem:[#allocation2 + $0x10] sm:$0xff]  ;;  %v29_v15 = vld [vmem:[#allocation2 + $0x18] sm:$0xff]  ;;  %s152_s0 = smov [#allocation5]   ;;  %s82_s18 = sshll.u32 %s179_s2, 4  ;;  %s83_s18 = int_to_ptr.hbm [resolvable:$true] %s82_s18 }
   0x7   :  { %43 = vperm.xlu0 %96, %v30_v1   ;;  %v50_v2 = vsel %vm49_vm0, 1, %v150_v0  ;;  %v33_v5 = vand.u32 127, %v32_v3  ;;  %s80_s1 = sshll.u32 %s152_s0, 4  ;;  %s81_s1 = int_to_ptr.vmem [resolvable:$true] %s80_s1 }
   0x9   :  { %v34_v6 = vadd.s32 128, %v33_v5  ;;  %v35_v7 = vadd.s32 256, %v33_v5  ;;  %v36_v8 = vadd.s32 384, %v33_v5 }
   0xf   :  { %52 = vperm.xlu0 %96, %v50_v2  }
  0x79   :  { %v44_v4 = vpop.permute.xlu0 %43 }
  0x7a   :  { %vm45_vm1 = vcmp.eq.s32.totalorder %v33_v5, %v44_v4  ;;  %vm46_vm3 = vcmp.eq.s32.totalorder %v34_v6, %v44_v4  ;;  %vm47_vm5 = vcmp.eq.s32.totalorder %v35_v7, %v44_v4  ;;  %vm48_vm7 = vcmp.eq.s32.totalorder %v36_v8, %v44_v4 }
  0x81   :  { %v53_v9 = vpop.permute.xlu0 %52 }
  0x82   :  { %vm54_vm2 = vcmp.eq.s32.totalorder %v53_v9, 1 }
  0x83   :  { %vm55_vm4 = vmand %vm45_vm1, %vm54_vm2 }
  0x84   :  { %vm56_vm6 = vmand %vm46_vm3, %vm54_vm2  ;;  %v59_v14 = vsel %vm55_vm4, 0.4, %v151_v13 }
  0x85   :  { %vm57_vm8 = vmand %vm47_vm5, %vm54_vm2  ;;  %v60_v16 = vsel %vm56_vm6, 0.4, %v151_v13  ;;  %v63_v17 = vsub.f32 %v26_v10, %v59_v14 }
  0x86   :  { %vm58_vm9 = vmand %vm48_vm7, %vm54_vm2  ;;  %v61_v18 = vsel %vm57_vm8, 0.4, %v151_v13  ;;  %v64_v19 = vsub.f32 %v27_v11, %v60_v16 }
  0x87   :  { %v62_v20 = vsel %vm58_vm9, 0.4, %v151_v13  ;;  %v65_v21 = vsub.f32 %v28_v12, %v61_v18  ;;  %v67_v22 = vmul.f32 64.0, %v63_v17 }
  0x88   :  { %v66_v23 = vsub.f32 %v29_v15, %v62_v20  ;;  %v68_v24 = vmul.f32 64.0, %v64_v19 }
  0x89   :  { %v69_v25 = vmul.f32 64.0, %v65_v21  ;;  %71 = vst [vmem:[#allocation5] sm:$0xff] %v67_v22 }
  0x8a   :  { %v70_v26 = vmul.f32 64.0, %v66_v23  ;;  %72 = vst [vmem:[#allocation5 + $0x8] sm:$0xff] %v68_v24 }
  0x8b   :  { %73 = vst [vmem:[#allocation5 + $0x10] sm:$0xff] %v69_v25 }
  0x8c   :  { %74 = vst [vmem:[#allocation5 + $0x18] sm:$0xff] %v70_v26 }
  0x8d   :  { %85 = dma.vmem_to_hbm [thread:$0]  %s81_s1, 512, %s83_s18, [#allocation4]  }
  0x8e   :  { %147 = dma.done.wait [#allocation4], 512  }
  0x8f   :  { %148 = vsyncadd [#allocation4], 4294966784 }
  0x90   :  { %90 = vsyncpa [#allocation3], 1 }
  0x91   :  { %91 = vsyncpa [#allocation4], 1 }

</bundles_post_ra>
